<compile_context>
chip_gen: v7x
topology: tpu7x:2x2x1
jax: 0.10.0
libtpu: 0.0.40
codegen_flags: <defaults>
</compile_context>

<pallas_src>
import jax
import jax.numpy as jnp
from jax import lax
from jax.experimental import pallas as pl
from jax.experimental.pallas import tpu as pltpu

EPS = 1e-5                      # torch BatchNorm default eps
_LANE = 128


def _vmem_capacity_bytes():
    """Physical VMEM per TensorCore (v5e/v6e: 128 MiB, v7x: 64 MiB)."""
    try:
        cap = getattr(pltpu.get_tpu_info(), "vmem_capacity_bytes", None)
        if cap:
            return int(cap)
    except Exception:
        pass
    return 64 << 20             # conservative fallback (v7x-sized) if query fails


def _make_kernel(*, n, pack, rows, sp, ts, nt, ragged):
    """Build the two-phase kernel, closing over the static layout config."""
    inv_cnt = 1.0 / (n * pack * sp)   # 1 / (N*H*W)  -- BN2d statistics count
    inv_s = 1.0 / (pack * sp)         # 1 / (H*W)    -- global-avg-pool divisor
    inv_n = 1.0 / n                   # BN1d batch divisor
    inv_tile = 1.0 / (rows * ts)      # first tile (always full) element count
    valid = sp - (nt - 1) * ts        # valid lanes of the (possibly ragged) last block

    def kernel(sc_ref,                 # SMEM (6,): bn1_g, bn1_b, g_w, g_b, gbn_g, gbn_b
               x_ref,                  # VMEM (rows, ts): packed input tile
               hw_ref, hb_ref,         # VMEM (1, O_pad): h.weight^T / h.bias (zero padded)
               out_ref,                # VMEM (N, O_pad)
               sum_ref, sq_ref,        # VMEM (rows, 1): per-row shifted sum / sum-of-squares
               shift_ref,              # VMEM (1, 1): first-tile mean (variance shift)
               a_ref, b_ref,           # VMEM (1, 1): folded BN2d scale / shift
               row_ref):               # VMEM (rows, 1): per packed-row relu sums
        ph = pl.program_id(0)          # 0: statistics pass, 1: apply pass
        s = pl.program_id(1)

        # f32 accumulation regardless of input dtype (callers may pass bf16 to halve
        # HBM traffic on v6e/v7x; math stays f32, which also keeps v5e happy).
        x = x_ref[...].astype(jnp.float32)

        def last_tile_mask():
            # Built only inside the ragged-block branches (not on every tile).
            lane = lax.broadcasted_iota(jnp.int32, (rows, ts), 1)
            return lane < valid

        # ---------------- phase 0: BN2d batch statistics (single pass) -------------
        @pl.when(ph == 0)
        def _stats():
            @pl.when(s == 0)
            def _init():
                # Shifted single-pass variance: the first tile is always full, so its
                # mean is a cheap, good shift against E[x^2]-mu^2 cancellation.
                shift_ref[...] = jnp.sum(x, keepdims=True) * inv_tile
                sum_ref[...] = jnp.zeros_like(sum_ref)
                sq_ref[...] = jnp.zeros_like(sq_ref)
                row_ref[...] = jnp.zeros_like(row_ref)

            shift = shift_ref[...]                                    # (1, 1)

            def acc_stats(mask):
                xs = x - shift
                if mask is not None:
                    # Zero stale OOB lanes BEFORE accumulating (select does not
                    # propagate garbage from the unselected branch).
                    xs = jnp.where(mask, xs, 0.0)
                sum_ref[...] += jnp.sum(xs, axis=1, keepdims=True)
                sq_ref[...] += jnp.sum(xs * xs, axis=1, keepdims=True)

            if ragged:
                @pl.when(s == nt - 1)
                def _masked():
                    acc_stats(last_tile_mask())

                @pl.when(s != nt - 1)
                def _full():
                    acc_stats(None)
            else:
                acc_stats(None)

            @pl.when(s == nt - 1)
            def _fold():
                # Fold BatchNorm2d into one scale/shift: xn = a*x + b (single scalar
                # fold of the per-row partials, done once).
                mu_s = jnp.sum(sum_ref[...], keepdims=True) * inv_cnt
                ex2 = jnp.sum(sq_ref[...], keepdims=True) * inv_cnt
                var = jnp.maximum(ex2 - mu_s * mu_s, 0.0)
                a = lax.rsqrt(var + EPS) * sc_ref[0]
                a_ref[...] = a
                b_ref[...] = sc_ref[1] - (mu_s + shift) * a

        # -------- phase 1: relu(a*x+b), pooled row sums, tiny epilogue --------------
        @pl.when(ph == 1)
        def _apply():
            def acc_rows(mask):
                xr = jnp.maximum(x * a_ref[...] + b_ref[...], 0.0)
                if mask is not None:
                    xr = jnp.where(mask, xr, 0.0)
                row_ref[...] += jnp.sum(xr, axis=1, keepdims=True)

            if ragged:
                # Phase 1 walks the tiles backwards (see x index_map), so the ragged
                # block nt-1 is grid step 0; only that step pays for the mask/select.
                @pl.when(s == 0)
                def _masked():
                    acc_rows(last_tile_mask())

                @pl.when(s != 0)
                def _full():
                    acc_rows(None)
            else:
                acc_rows(None)

            @pl.when(s == nt - 1)
            def _finalize():
                rs = row_ref[...]                                     # (rows, 1)
                if pack > 1:
                    # Collapse the `pack` packed rows of each sample with a tiny
                    # selection matmul (avoids sublane reshapes / strided loads).
                    n_idx = lax.broadcasted_iota(jnp.int32, (n, rows), 0)
                    r_idx = lax.broadcasted_iota(jnp.int32, (n, rows), 1)
                    sel = jnp.logical_and(r_idx >= n_idx * pack,
                                          r_idx < (n_idx + 1) * pack)
                    rs = jnp.dot(sel.astype(jnp.float32), rs,
                                 preferred_element_type=jnp.float32)  # (N, 1)
                feat = rs * inv_s                 # AvgPool2d(8)+AdaptiveAvgPool2d == mean

                # h = Linear(1, O); g = Linear(1, 1)
                h = feat * hw_ref[...] + hb_ref[...]                  # (N, O_pad)
                g = feat * sc_ref[2] + sc_ref[3]                      # (N, 1)

                # BatchNorm1d(1), training-mode batch stats (biased variance).
                gmu = jnp.sum(g, axis=0, keepdims=True) * inv_n       # (1, 1)
                gd = g - gmu
                gvar = jnp.sum(gd * gd, axis=0, keepdims=True) * inv_n
                gn = gd * (lax.rsqrt(gvar + EPS) * sc_ref[4]) + sc_ref[5]

                # torch.div(h, sigmoid(gn)) == h * (1 + exp(-gn))  (exp rides the EUP)
                out_ref[...] = h * (1.0 + jnp.exp(-gn))

    return kernel


def generalized_odin(x, params, *, s_tile=None):
    """GeneralizedOdin forward.  x: (N, C=1, H, W), H % 8 == 0, W % 8 == 0."""
    N, C, H, W = x.shape
    assert C == 1, "Linear(in_features=1) requires a single channel"
    assert N >= 2, "BatchNorm1d training mode needs batch > 1 (torch errors too)"
    # TODO(synk): general H,W (not multiples of 8) needs BN2d stats over the full
    # extent but pooling over the floor-cropped extent; add an in-kernel crop mask.
    assert H % 8 == 0 and W % 8 == 0, "H and W must be multiples of 8"

    S = H * W
    # Sublane packing: for small N, view (N, S) as (N*8, S//8) (free contiguous
    # reshape) so the elementwise passes use all 8 sublanes of each vreg.
    pack = 8 if N < 8 else 1
    rows = N * pack
    sp = S // pack
    itemsize = x.dtype.itemsize

    out_size = params["h_w"].shape[0]
    o_pad = pl.cdiv(out_size, _LANE) * _LANE   # lane-dense output (no masked stores)

    # ------------------- per-generation VMEM budgeting ---------------------------
    vmem_cap = _vmem_capacity_bytes()                       # 128 MiB v5e/v6e, 64 MiB v7x
    vmem_limit = min(vmem_cap - (16 << 20), 100 << 20)      # headroom for compiler scratch
    vmem_limit = max(min(vmem_limit, vmem_cap), 24 << 20)   # ~48 MiB v7x, ~100 MiB v5e/v6e
    rows_pad = ((rows + 7) // 8) * 8
    overhead = (2 * N * o_pad * 4            # double-buffered output block
                + 4 * o_pad * 4              # h weight / bias blocks
                + 3 * rows_pad * 512         # (rows,1) f32 scratch, (8,128)-tiled
                + 3 * 4096                   # (1,1) f32 scratch
                + (2 << 20))                 # slack
    avail = vmem_limit - overhead

    slab_bytes = rows * sp * itemsize
    if s_tile is None:
        if 2 * slab_bytes <= avail:
            # Resident-slab fast path: constant x block index across the whole grid,
            # so the slab is DMA'd from HBM exactly once (phase 1 reuses the copy).
            ts = sp
        else:
            # Streaming path: ~8-12 MiB double-buffered blocks (amortizes the
            # ~0.35 us per-grid-step overhead; fits v7x's 64 MiB VMEM with headroom).
            # TODO(synk): very large N (rows > ~24K) would additionally need batch tiling.
            blk_budget = min(12 << 20, avail // 4)
            ts = max(_LANE, (blk_budget // (rows * itemsize)) // _LANE * _LANE)
            ts = min(ts, sp)
    else:
        ts = min(s_tile, sp)
    assert ts == sp or ts % _LANE == 0, "spatial tile must be a multiple of 128"
    nt = pl.cdiv(sp, ts)
    ragged = (sp % ts) != 0

    # Free (contiguous) reshape; no HBM copy.  dtype passes through, so bf16
    # producers halve HBM bytes without any extra cast pass in the wrapper.
    x2d = x.reshape(rows, sp)

    hw = jnp.pad(jnp.asarray(params["h_w"], jnp.float32).reshape(1, out_size),
                 ((0, 0), (0, o_pad - out_size)))
    hb = jnp.pad(jnp.asarray(params["h_b"], jnp.float32).reshape(1, out_size),
                 ((0, 0), (0, o_pad - out_size)))
    scalars = jnp.asarray(
        [params["bn1_gamma"], params["bn1_beta"],
         params["g_w"], params["g_b"],
         params["gbn_gamma"], params["gbn_beta"]], dtype=jnp.float32)

    kernel = _make_kernel(n=N, pack=pack, rows=rows, sp=sp, ts=ts, nt=nt,
                          ragged=ragged)

    def x_index_map(ph, s, sc):
        # Phase 0 walks forward, phase 1 walks backward, so the block at the phase
        # boundary (nt-1) is reused without a fresh DMA.
        return (0, s + ph * (nt - 1 - 2 * s))

    grid_spec = pltpu.PrefetchScalarGridSpec(
        num_scalar_prefetch=1,             # `scalars` -> SMEM
        grid=(2, nt),                      # (phase, spatial tile)
        in_specs=[
            pl.BlockSpec((rows, ts), x_index_map),                 # x tiles
            pl.BlockSpec((1, o_pad), lambda ph, s, sc: (0, 0)),    # h weight (fetched once)
            pl.BlockSpec((1, o_pad), lambda ph, s, sc: (0, 0)),    # h bias   (fetched once)
        ],
        out_specs=pl.BlockSpec((N, o_pad), lambda ph, s, sc: (0, 0)),
        scratch_shapes=[
            pltpu.VMEM((rows, 1), jnp.float32),   # per-row shifted sum
            pltpu.VMEM((rows, 1), jnp.float32),   # per-row shifted sum of squares
            pltpu.VMEM((1, 1), jnp.float32),      # shift (first-tile mean)
            pltpu.VMEM((1, 1), jnp.float32),      # folded BN scale a
            pltpu.VMEM((1, 1), jnp.float32),      # folded BN shift b
            pltpu.VMEM((rows, 1), jnp.float32),   # per packed-row relu sums
        ],
    )

    out = pl.pallas_call(
        kernel,
        out_shape=jax.ShapeDtypeStruct((N, o_pad), jnp.float32),
        grid_spec=grid_spec,
        compiler_params=pltpu.CompilerParams(
            # Phase 1 depends on phase 0's statistics and every spatial tile updates
            # the shared accumulators -> both grid axes are sequential.  Single-TC by
            # design: the kernel is HBM-bound, so a 2-TC split buys nothing but sync.
            dimension_semantics=("arbitrary", "arbitrary"),
            vmem_limit_bytes=int(vmem_limit)),
    )(scalars, x2d, hw, hb)

    return out[:, :out_size]


def reference(x, p):
    """Pure-JAX replica of the PyTorch forward (training-mode batch norms)."""
    N, C, H, W = x.shape
    xf = x.astype(jnp.float32)
    mu = jnp.mean(xf, axis=(0, 2, 3), keepdims=True)
    var = jnp.mean((xf - mu) ** 2, axis=(0, 2, 3), keepdims=True)
    xn = (xf - mu) / jnp.sqrt(var + EPS) * p["bn1_gamma"] + p["bn1_beta"]
    xr = jnp.maximum(xn, 0.0)
    Hc, Wc = (H // 8) * 8, (W // 8) * 8
    pooled = xr[:, :, :Hc, :Wc].reshape(N, C, Hc // 8, 8, Wc // 8, 8).mean(axis=(3, 5))
    feat = pooled.mean(axis=(2, 3))                          # (N, C) == (N, 1)
    h = feat @ jnp.asarray(p["h_w"], jnp.float32).T + jnp.asarray(p["h_b"], jnp.float32)
    g = feat * p["g_w"] + p["g_b"]                           # (N, 1)
    gmu = jnp.mean(g, axis=0, keepdims=True)
    gvar = jnp.mean((g - gmu) ** 2, axis=0, keepdims=True)
    gn = (g - gmu) / jnp.sqrt(gvar + EPS) * p["gbn_gamma"] + p["gbn_beta"]
    return h / jax.nn.sigmoid(gn)


if __name__ == "__main__":
    # C must be 1 (Linear(in_features=1)); batch=2, 64x72 spatial, 10 classes.
    # W=72 makes the forced-streaming run exercise the ragged-last-tile path.
    N, C, H, W = 2, 1, 64, 72
    OUT = 10

    key = jax.random.PRNGKey(0)
    kx, k1, k2, k3, k4, k5, k6, k7, k8 = jax.random.split(key, 9)

    # Per-sample offset keeps the BatchNorm1d batch variance well above eps so the
    # kernel/reference comparison is numerically well conditioned.
    x = (jax.random.normal(kx, (N, C, H, W), dtype=jnp.float32) + 0.5
         + jnp.arange(N, dtype=jnp.float32).reshape(N, 1, 1, 1))

    params = {
        # BatchNorm2d(1) affine params
        "bn1_gamma": float(1.0 + 0.1 * jax.random.normal(k1, ())),
        "bn1_beta": float(0.1 * jax.random.normal(k2, ())),
        # h = Linear(1, OUT):  weight (OUT, 1), bias (OUT,)
        "h_w": jax.random.normal(k3, (OUT, 1), dtype=jnp.float32),
        "h_b": jax.random.normal(k4, (OUT,), dtype=jnp.float32) * 0.1,
        # g = Linear(1, 1)
        "g_w": float(1.0 + 0.3 * jax.random.normal(k5, ())),
        "g_b": float(0.1 * jax.random.normal(k6, ())),
        # g_bn = BatchNorm1d(1) affine params
        "gbn_gamma": float(1.0 + 0.1 * jax.random.normal(k7, ())),
        "gbn_beta": float(0.1 * jax.random.normal(k8, ())),
    }

    ref = reference(x, params)

    # Default path: the packed slab fits in VMEM -> resident fast path (x is read
    # from HBM exactly once; phase 1 reuses the VMEM copy).
    out_res = jax.block_until_ready(generalized_odin(x, params))
    assert out_res.shape == (N, OUT)
    assert jnp.allclose(out_res, ref, rtol=1e-3, atol=1e-3), (out_res, ref)

    # Forced streaming path: s_tile=128 -> 5 spatial tiles including a ragged last
    # tile, exercising the two-phase accumulation, the reversed phase-1 traversal
    # and the masked-last-tile branches.
    out_str = jax.block_until_ready(generalized_odin(x, params, s_tile=128))
    assert jnp.allclose(out_str, ref, rtol=1e-3, atol=1e-3), (out_str, ref)

    print("KERNEL_OK")
</pallas_src>

<mosaic_0001>
module attributes {stable_mosaic.version = 11 : i64} {
  func.func @kernel(%arg0: i32, %arg1: i32, %arg2: memref<6xf32, #tpu.memory_space<smem>>, %arg3: memref<16x576xf32, #tpu.memory_space<vmem>>, %arg4: memref<1x128xf32, #tpu.memory_space<vmem>>, %arg5: memref<1x128xf32, #tpu.memory_space<vmem>>, %arg6: memref<2x128xf32, #tpu.memory_space<vmem>>, %arg7: memref<16x1xf32, #tpu.memory_space<vmem>>, %arg8: memref<16x1xf32, #tpu.memory_space<vmem>>, %arg9: memref<1x1xf32, #tpu.memory_space<vmem>>, %arg10: memref<1x1xf32, #tpu.memory_space<vmem>>, %arg11: memref<1x1xf32, #tpu.memory_space<vmem>>, %arg12: memref<16x1xf32, #tpu.memory_space<vmem>>) attributes {dimension_semantics = [#tpu.dimension_semantics<arbitrary>, #tpu.dimension_semantics<arbitrary>], iteration_bounds = array<i64: 2, 1>, scalar_prefetch = 1 : i64, scratch_operands = 6 : i64, tpu.core_type = #tpu.core_type<tc>, window_params = [{transform_indices = @transform_0, window_bounds = array<i64: 16, 576>}, {pipeline_mode = #tpu.pipeline_mode<synchronous>, transform_indices = @transform_1, window_bounds = array<i64: 1, 128>}, {pipeline_mode = #tpu.pipeline_mode<synchronous>, transform_indices = @transform_2, window_bounds = array<i64: 1, 128>}, {pipeline_mode = #tpu.pipeline_mode<synchronous>, transform_indices = @transform_3, window_bounds = array<i64: 2, 128>}]} {
    %c0 = arith.constant 0 : index
    %c0_0 = arith.constant 0 : index
    %0 = vector.load %arg3[%c0, %c0_0] : memref<16x576xf32, #tpu.memory_space<vmem>>, vector<16x576xf32>
    %c0_i32 = arith.constant 0 : i32
    %1 = arith.cmpi eq, %arg0, %c0_i32 : i32
    %2 = arith.extui %1 : i1 to i32
    %c0_i32_1 = arith.constant 0 : i32
    %3 = arith.cmpi ne, %2, %c0_i32_1 : i32
    scf.if %3 {
      %c0_i32_3 = arith.constant 0 : i32
      %7 = arith.cmpi eq, %arg1, %c0_i32_3 : i32
      %8 = arith.extui %7 : i1 to i32
      %c0_i32_4 = arith.constant 0 : i32
      %9 = arith.cmpi ne, %8, %c0_i32_4 : i32
      scf.if %9 {
        %27 = vector.shape_cast %0 : vector<16x576xf32> to vector<1x16x576xf32>
        %cst_18 = arith.constant dense<0.000000e+00> : vector<1xf32>
        %28 = vector.multi_reduction <add>, %27, %cst_18 [1, 2] : vector<1x16x576xf32> to vector<1xf32>
        %29 = vector.shape_cast %28 : vector<1xf32> to vector<1x1x1xf32>
        %30 = vector.extract %29[0, 0, 0] : f32 from vector<1x1x1xf32>
        %31 = vector.broadcast %30 : f32 to vector<1x1xf32>
        %cst_19 = arith.constant 1.08506945E-4 : f32
        %32 = vector.broadcast %cst_19 : f32 to vector<1x1xf32>
        %33 = arith.mulf %31, %32 : vector<1x1xf32>
        %c0_20 = arith.constant 0 : index
        %c0_21 = arith.constant 0 : index
        %34 = vector.load %arg9[%c0_20, %c0_21] : memref<1x1xf32, #tpu.memory_space<vmem>>, vector<1x1xf32>
        tpu.vector_store %arg9[%c0_20, %c0_21], %33 {strides = array<i32>} : memref<1x1xf32, #tpu.memory_space<vmem>>, vector<1x1xf32>,
        %cst_22 = arith.constant 0.000000e+00 : f32
        %35 = vector.broadcast %cst_22 : f32 to vector<16x1xf32>
        %c0_23 = arith.constant 0 : index
        %c0_24 = arith.constant 0 : index
        %36 = vector.load %arg7[%c0_23, %c0_24] : memref<16x1xf32, #tpu.memory_space<vmem>>, vector<16x1xf32>
        tpu.vector_store %arg7[%c0_23, %c0_24], %35 {strides = array<i32>} : memref<16x1xf32, #tpu.memory_space<vmem>>, vector<16x1xf32>,
        %cst_25 = arith.constant 0.000000e+00 : f32
        %37 = vector.broadcast %cst_25 : f32 to vector<16x1xf32>
        %c0_26 = arith.constant 0 : index
        %c0_27 = arith.constant 0 : index
        %38 = vector.load %arg8[%c0_26, %c0_27] : memref<16x1xf32, #tpu.memory_space<vmem>>, vector<16x1xf32>
        tpu.vector_store %arg8[%c0_26, %c0_27], %37 {strides = array<i32>} : memref<16x1xf32, #tpu.memory_space<vmem>>, vector<16x1xf32>,
        %cst_28 = arith.constant 0.000000e+00 : f32
        %39 = vector.broadcast %cst_28 : f32 to vector<16x1xf32>
        %c0_29 = arith.constant 0 : index
        %c0_30 = arith.constant 0 : index
        %40 = vector.load %arg12[%c0_29, %c0_30] : memref<16x1xf32, #tpu.memory_space<vmem>>, vector<16x1xf32>
        tpu.vector_store %arg12[%c0_29, %c0_30], %39 {strides = array<i32>} : memref<16x1xf32, #tpu.memory_space<vmem>>, vector<16x1xf32>,
      } else {
      }
      %c0_5 = arith.constant 0 : index
      %c0_6 = arith.constant 0 : index
      %10 = vector.load %arg9[%c0_5, %c0_6] : memref<1x1xf32, #tpu.memory_space<vmem>>, vector<1x1xf32>
      %11 = vector.broadcast %10 : vector<1x1xf32> to vector<16x576xf32>
      %12 = arith.subf %0, %11 : vector<16x576xf32>
      %c0_7 = arith.constant 0 : index
      %c0_8 = arith.constant 0 : index
      %13 = vector.load %arg7[%c0_7, %c0_8] : memref<16x1xf32, #tpu.memory_space<vmem>>, vector<16x1xf32>
      %cst = arith.constant dense<0.000000e+00> : vector<16xf32>
      %14 = vector.multi_reduction <add>, %12, %cst [1] : vector<16x576xf32> to vector<16xf32>
      %15 = vector.shape_cast %14 : vector<16xf32> to vector<16x1xf32>
      %16 = arith.addf %13, %15 : vector<16x1xf32>
      %c0_9 = arith.constant 0 : index
      %c0_10 = arith.constant 0 : index
      %17 = vector.load %arg7[%c0_9, %c0_10] : memref<16x1xf32, #tpu.memory_space<vmem>>, vector<16x1xf32>
      tpu.vector_store %arg7[%c0_9, %c0_10], %16 {strides = array<i32>} : memref<16x1xf32, #tpu.memory_space<vmem>>, vector<16x1xf32>,
      %c0_11 = arith.constant 0 : index
      %c0_12 = arith.constant 0 : index
      %18 = vector.load %arg8[%c0_11, %c0_12] : memref<16x1xf32, #tpu.memory_space<vmem>>, vector<16x1xf32>
      %19 = arith.mulf %12, %12 : vector<16x576xf32>
      %cst_13 = arith.constant dense<0.000000e+00> : vector<16xf32>
      %20 = vector.multi_reduction <add>, %19, %cst_13 [1] : vector<16x576xf32> to vector<16xf32>
      %21 = vector.shape_cast %20 : vector<16xf32> to vector<16x1xf32>
      %22 = arith.addf %18, %21 : vector<16x1xf32>
      %c0_14 = arith.constant 0 : index
      %c0_15 = arith.constant 0 : index
      %23 = vector.load %arg8[%c0_14, %c0_15] : memref<16x1xf32, #tpu.memory_space<vmem>>, vector<16x1xf32>
      tpu.vector_store %arg8[%c0_14, %c0_15], %22 {strides = array<i32>} : memref<16x1xf32, #tpu.memory_space<vmem>>, vector<16x1xf32>,
      %c0_i32_16 = arith.constant 0 : i32
      %24 = arith.cmpi eq, %arg1, %c0_i32_16 : i32
      %25 = arith.extui %24 : i1 to i32
      %c0_i32_17 = arith.constant 0 : i32
      %26 = arith.cmpi ne, %25, %c0_i32_17 : i32
      scf.if %26 {
        %c0_18 = arith.constant 0 : index
        %c0_19 = arith.constant 0 : index
        %27 = vector.load %arg7[%c0_18, %c0_19] : memref<16x1xf32, #tpu.memory_space<vmem>>, vector<16x1xf32>
        %28 = vector.shape_cast %27 : vector<16x1xf32> to vector<1x16x1xf32>
        %cst_20 = arith.constant dense<0.000000e+00> : vector<1xf32>
        %29 = vector.multi_reduction <add>, %28, %cst_20 [1, 2] : vector<1x16x1xf32> to vector<1xf32>
        %30 = vector.shape_cast %29 : vector<1xf32> to vector<1x1x1xf32>
        %31 = vector.extract %30[0, 0, 0] : f32 from vector<1x1x1xf32>
        %32 = vector.broadcast %31 : f32 to vector<1x1xf32>
        %cst_21 = arith.constant 1.08506945E-4 : f32
        %33 = vector.broadcast %cst_21 : f32 to vector<1x1xf32>
        %34 = arith.mulf %32, %33 : vector<1x1xf32>
        %c0_22 = arith.constant 0 : index
        %c0_23 = arith.constant 0 : index
        %35 = vector.load %arg8[%c0_22, %c0_23] : memref<16x1xf32, #tpu.memory_space<vmem>>, vector<16x1xf32>
        %36 = vector.shape_cast %35 : vector<16x1xf32> to vector<1x16x1xf32>
        %cst_24 = arith.constant dense<0.000000e+00> : vector<1xf32>
        %37 = vector.multi_reduction <add>, %36, %cst_24 [1, 2] : vector<1x16x1xf32> to vector<1xf32>
        %38 = vector.shape_cast %37 : vector<1xf32> to vector<1x1x1xf32>
        %39 = vector.extract %38[0, 0, 0] : f32 from vector<1x1x1xf32>
        %40 = vector.broadcast %39 : f32 to vector<1x1xf32>
        %cst_25 = arith.constant 1.08506945E-4 : f32
        %41 = vector.broadcast %cst_25 : f32 to vector<1x1xf32>
        %42 = arith.mulf %40, %41 : vector<1x1xf32>
        %43 = arith.mulf %34, %34 : vector<1x1xf32>
        %44 = arith.subf %42, %43 : vector<1x1xf32>
        %cst_26 = arith.constant 0.000000e+00 : f32
        %45 = vector.broadcast %cst_26 : f32 to vector<1x1xf32>
        %46 = arith.maximumf %44, %45 : vector<1x1xf32>
        %cst_27 = arith.constant 9.99999974E-6 : f32
        %47 = vector.broadcast %cst_27 : f32 to vector<1x1xf32>
        %48 = arith.addf %46, %47 : vector<1x1xf32>
        %49 = math.rsqrt %48 : vector<1x1xf32>
        %c0_28 = arith.constant 0 : index
        %50 = memref.load %arg2[%c0_28] : memref<6xf32, #tpu.memory_space<smem>>
        %51 = vector.broadcast %50 : f32 to vector<1x1xf32>
        %52 = arith.mulf %49, %51 : vector<1x1xf32>
        %c0_29 = arith.constant 0 : index
        %c0_30 = arith.constant 0 : index
        %53 = vector.load %arg10[%c0_29, %c0_30] : memref<1x1xf32, #tpu.memory_space<vmem>>, vector<1x1xf32>
        tpu.vector_store %arg10[%c0_29, %c0_30], %52 {strides = array<i32>} : memref<1x1xf32, #tpu.memory_space<vmem>>, vector<1x1xf32>,
        %c1 = arith.constant 1 : index
        %54 = memref.load %arg2[%c1] : memref<6xf32, #tpu.memory_space<smem>>
        %55 = arith.addf %34, %10 : vector<1x1xf32>
        %56 = arith.mulf %55, %52 : vector<1x1xf32>
        %57 = vector.broadcast %54 : f32 to vector<1x1xf32>
        %58 = arith.subf %57, %56 : vector<1x1xf32>
        %c0_31 = arith.constant 0 : index
        %c0_32 = arith.constant 0 : index
        %59 = vector.load %arg11[%c0_31, %c0_32] : memref<1x1xf32, #tpu.memory_space<vmem>>, vector<1x1xf32>
        tpu.vector_store %arg11[%c0_31, %c0_32], %58 {strides = array<i32>} : memref<1x1xf32, #tpu.memory_space<vmem>>, vector<1x1xf32>,
      } else {
      }
    } else {
    }
    %c1_i32 = arith.constant 1 : i32
    %4 = arith.cmpi eq, %arg0, %c1_i32 : i32
    %5 = arith.extui %4 : i1 to i32
    %c0_i32_2 = arith.constant 0 : i32
    %6 = arith.cmpi ne, %5, %c0_i32_2 : i32
    scf.if %6 {
      %c0_3 = arith.constant 0 : index
      %c0_4 = arith.constant 0 : index
      %7 = vector.load %arg10[%c0_3, %c0_4] : memref<1x1xf32, #tpu.memory_space<vmem>>, vector<1x1xf32>
      %8 = vector.broadcast %7 : vector<1x1xf32> to vector<16x576xf32>
      %9 = arith.mulf %0, %8 : vector<16x576xf32>
      %c0_5 = arith.constant 0 : index
      %c0_6 = arith.constant 0 : index
      %10 = vector.load %arg11[%c0_5, %c0_6] : memref<1x1xf32, #tpu.memory_space<vmem>>, vector<1x1xf32>
      %11 = vector.broadcast %10 : vector<1x1xf32> to vector<16x576xf32>
      %12 = arith.addf %9, %11 : vector<16x576xf32>
      %cst = arith.constant 0.000000e+00 : f32
      %13 = vector.broadcast %cst : f32 to vector<16x576xf32>
      %14 = arith.maximumf %12, %13 : vector<16x576xf32>
      %c0_7 = arith.constant 0 : index
      %c0_8 = arith.constant 0 : index
      %15 = vector.load %arg12[%c0_7, %c0_8] : memref<16x1xf32, #tpu.memory_space<vmem>>, vector<16x1xf32>
      %cst_9 = arith.constant dense<0.000000e+00> : vector<16xf32>
      %16 = vector.multi_reduction <add>, %14, %cst_9 [1] : vector<16x576xf32> to vector<16xf32>
      %17 = vector.shape_cast %16 : vector<16xf32> to vector<16x1xf32>
      %18 = arith.addf %15, %17 : vector<16x1xf32>
      %c0_10 = arith.constant 0 : index
      %c0_11 = arith.constant 0 : index
      %19 = vector.load %arg12[%c0_10, %c0_11] : memref<16x1xf32, #tpu.memory_space<vmem>>, vector<16x1xf32>
      tpu.vector_store %arg12[%c0_10, %c0_11], %18 {strides = array<i32>} : memref<16x1xf32, #tpu.memory_space<vmem>>, vector<16x1xf32>,
      %c0_i32_12 = arith.constant 0 : i32
      %20 = arith.cmpi eq, %arg1, %c0_i32_12 : i32
      %21 = arith.extui %20 : i1 to i32
      %c0_i32_13 = arith.constant 0 : i32
      %22 = arith.cmpi ne, %21, %c0_i32_13 : i32
      scf.if %22 {
        %c0_14 = arith.constant 0 : index
        %c0_15 = arith.constant 0 : index
        %23 = vector.load %arg12[%c0_14, %c0_15] : memref<16x1xf32, #tpu.memory_space<vmem>>, vector<16x1xf32>
        %24 = tpu.iota {dimensions = array<i32: 0>} : vector<2x16xi32>
        %25 = tpu.iota {dimensions = array<i32: 1>} : vector<2x16xi32>
        %c8_i32 = arith.constant 8 : i32
        %26 = vector.broadcast %c8_i32 : i32 to vector<2x16xi32>
        %27 = arith.muli %24, %26 : vector<2x16xi32>
        %28 = arith.cmpi sge, %25, %27 : vector<2x16xi32>
        %c1_i32_16 = arith.constant 1 : i32
        %29 = vector.broadcast %c1_i32_16 : i32 to vector<2x16xi32>
        %30 = arith.addi %24, %29 : vector<2x16xi32>
        %c8_i32_17 = arith.constant 8 : i32
        %31 = vector.broadcast %c8_i32_17 : i32 to vector<2x16xi32>
        %32 = arith.muli %30, %31 : vector<2x16xi32>
        %33 = arith.cmpi slt, %25, %32 : vector<2x16xi32>
        %34 = arith.andi %28, %33 : vector<2x16xi1>
        %35 = arith.extui %34 : vector<2x16xi1> to vector<2x16xi32>
        %36 = arith.sitofp %35 : vector<2x16xi32> to vector<2x16xf32>
        %cst_18 = arith.constant dense<0.000000e+00> : vector<2x1xf32>
        %37 = tpu.matmul %36, %23, %cst_18 {dimension_numbers = #tpu.dot_dimension_numbers<[1], [0], [0], [1], [0, 0, 1, 1], [], []>} : vector<2x16xf32>, vector<16x1xf32>, vector<2x1xf32> -> vector<2x1xf32>
        %cst_19 = arith.constant 2.17013891E-4 : f32
        %38 = vector.broadcast %cst_19 : f32 to vector<2x1xf32>
        %39 = arith.mulf %37, %38 : vector<2x1xf32>
        %c0_20 = arith.constant 0 : index
        %c0_21 = arith.constant 0 : index
        %40 = vector.load %arg4[%c0_20, %c0_21] : memref<1x128xf32, #tpu.memory_space<vmem>>, vector<1x128xf32>
        %41 = vector.broadcast %39 : vector<2x1xf32> to vector<2x128xf32>
        %42 = vector.broadcast %40 : vector<1x128xf32> to vector<2x128xf32>
        %43 = arith.mulf %41, %42 : vector<2x128xf32>
        %c0_22 = arith.constant 0 : index
        %c0_23 = arith.constant 0 : index
        %44 = vector.load %arg5[%c0_22, %c0_23] : memref<1x128xf32, #tpu.memory_space<vmem>>, vector<1x128xf32>
        %45 = vector.broadcast %44 : vector<1x128xf32> to vector<2x128xf32>
        %46 = arith.addf %43, %45 : vector<2x128xf32>
        %c2 = arith.constant 2 : index
        %47 = memref.load %arg2[%c2] : memref<6xf32, #tpu.memory_space<smem>>
        %48 = vector.broadcast %47 : f32 to vector<2x1xf32>
        %49 = arith.mulf %39, %48 : vector<2x1xf32>
        %c3 = arith.constant 3 : index
        %50 = memref.load %arg2[%c3] : memref<6xf32, #tpu.memory_space<smem>>
        %51 = vector.broadcast %50 : f32 to vector<2x1xf32>
        %52 = arith.addf %49, %51 : vector<2x1xf32>
        %cst_24 = arith.constant dense<0.000000e+00> : vector<1xf32>
        %53 = vector.multi_reduction <add>, %52, %cst_24 [0] : vector<2x1xf32> to vector<1xf32>
        %54 = vector.shape_cast %53 : vector<1xf32> to vector<1x1xf32>
        %cst_25 = arith.constant 5.000000e-01 : f32
        %55 = vector.broadcast %cst_25 : f32 to vector<1x1xf32>
        %56 = arith.mulf %54, %55 : vector<1x1xf32>
        %57 = vector.broadcast %56 : vector<1x1xf32> to vector<2x1xf32>
        %58 = arith.subf %52, %57 : vector<2x1xf32>
        %59 = arith.mulf %58, %58 : vector<2x1xf32>
        %cst_26 = arith.constant dense<0.000000e+00> : vector<1xf32>
        %60 = vector.multi_reduction <add>, %59, %cst_26 [0] : vector<2x1xf32> to vector<1xf32>
        %61 = vector.shape_cast %60 : vector<1xf32> to vector<1x1xf32>
        %cst_27 = arith.constant 5.000000e-01 : f32
        %62 = vector.broadcast %cst_27 : f32 to vector<1x1xf32>
        %63 = arith.mulf %61, %62 : vector<1x1xf32>
        %cst_28 = arith.constant 9.99999974E-6 : f32
        %64 = vector.broadcast %cst_28 : f32 to vector<1x1xf32>
        %65 = arith.addf %63, %64 : vector<1x1xf32>
        %66 = math.rsqrt %65 : vector<1x1xf32>
        %c4 = arith.constant 4 : index
        %67 = memref.load %arg2[%c4] : memref<6xf32, #tpu.memory_space<smem>>
        %68 = vector.broadcast %67 : f32 to vector<1x1xf32>
        %69 = arith.mulf %66, %68 : vector<1x1xf32>
        %70 = vector.broadcast %69 : vector<1x1xf32> to vector<2x1xf32>
        %71 = arith.mulf %58, %70 : vector<2x1xf32>
        %c5 = arith.constant 5 : index
        %72 = memref.load %arg2[%c5] : memref<6xf32, #tpu.memory_space<smem>>
        %73 = vector.broadcast %72 : f32 to vector<2x1xf32>
        %74 = arith.addf %71, %73 : vector<2x1xf32>
        %cst_29 = arith.constant 0.000000e+00 : f32
        %75 = vector.broadcast %cst_29 : f32 to vector<2x1xf32>
        %76 = arith.subf %75, %74 : vector<2x1xf32>
        %77 = math.exp %76 : vector<2x1xf32>
        %cst_30 = arith.constant 1.000000e+00 : f32
        %78 = vector.broadcast %cst_30 : f32 to vector<2x1xf32>
        %79 = arith.addf %78, %77 : vector<2x1xf32>
        %80 = vector.broadcast %79 : vector<2x1xf32> to vector<2x128xf32>
        %81 = arith.mulf %46, %80 : vector<2x128xf32>
        %c0_31 = arith.constant 0 : index
        %c0_32 = arith.constant 0 : index
        %82 = vector.load %arg6[%c0_31, %c0_32] : memref<2x128xf32, #tpu.memory_space<vmem>>, vector<2x128xf32>
        tpu.vector_store %arg6[%c0_31, %c0_32], %81 {strides = array<i32>} : memref<2x128xf32, #tpu.memory_space<vmem>>, vector<2x128xf32>,
      } else {
      }
    } else {
    }
    return
  }
  func.func @transform_0(%arg0: i32, %arg1: i32, %arg2: memref<6xf32, #tpu.memory_space<smem>>) -> (i32, i32) {
    %c2_i32 = arith.constant 2 : i32
    %0 = arith.muli %c2_i32, %arg1 : i32
    %c0_i32 = arith.constant 0 : i32
    %1 = arith.subi %c0_i32, %0 : i32
    %2 = arith.muli %arg0, %1 : i32
    %3 = arith.addi %arg1, %2 : i32
    %c0_i32_0 = arith.constant 0 : i32
    %c0_i32_1 = arith.constant 0 : i32
    return %c0_i32_0, %3 : i32, i32
  }
  func.func @transform_1(%arg0: i32, %arg1: i32, %arg2: memref<6xf32, #tpu.memory_space<smem>>) -> (i32, i32) {
    %c0_i32 = arith.constant 0 : i32
    %c0_i32_0 = arith.constant 0 : i32
    %c0_i32_1 = arith.constant 0 : i32
    return %c0_i32, %c0_i32_0 : i32, i32
  }
  func.func @transform_2(%arg0: i32, %arg1: i32, %arg2: memref<6xf32, #tpu.memory_space<smem>>) -> (i32, i32) {
    %c0_i32 = arith.constant 0 : i32
    %c0_i32_0 = arith.constant 0 : i32
    %c0_i32_1 = arith.constant 0 : i32
    return %c0_i32, %c0_i32_0 : i32, i32
  }
  func.func @transform_3(%arg0: i32, %arg1: i32, %arg2: memref<6xf32, #tpu.memory_space<smem>>) -> (i32, i32) {
    %c0_i32 = arith.constant 0 : i32
    %c0_i32_0 = arith.constant 0 : i32
    %c0_i32_1 = arith.constant 0 : i32
    return %c0_i32, %c0_i32_0 : i32, i32
  }
}

</mosaic_0001>

<bundles_post_ra>
// kernel: tpu_custom_call.1
= control target key start
LH: loop header
LB: loop body
LE: loop exit
PB: predicated region body
PF: predicated region fallthrough
CT: control target
= control target key end

     0   :  { %s1106_s0 = inlined_call_operand.hbm [shape: f32[6], index: 0, kind: input, shape index: {}]   ;;  %s1107_s1 = inlined_call_operand.hbm [shape: f32[16,576], index: 1, kind: input, shape index: {}]   ;;  %s1108_s2 = inlined_call_operand.vmem [shape: f32[1,128], index: 2, kind: input, shape index: {}]   ;;  %s1109_s3 = inlined_call_operand.vmem [shape: f32[1,128], index: 3, kind: input, shape index: {}]   ;;  %s1110_s4 = inlined_call_operand.hbm [shape: f32[2,128], index: 4, kind: output, shape index: {}]  }
   0x1   :  { %s789_s17 = scalar_lea.hbm %s1106_s0, 16 }
   0x2   :  { %p790_p0 = scmp.ne.s32.totalorder %s1106_s0, %s789_s17  ;;  %p793_p1 = scmp.lt.u32.totalorder %s789_s17, %s1106_s0 }
   0x4   :  { %p795_p2 = pnand %p793_p1, %p790_p0 }
   0x6   :  { %798 = shalt.err (!%p795_p2)  }
   0x7   :  { %s887_s22 = smov [#allocation9]  }
   0x8   :  { %10 = dma.hbm_to_smem %s1106_s0, 16, %s887_s22, [#allocation8] }
   0x9   :  { %865 = dma.done.wait [#allocation8], 16 }
   0xa   :  { %866 = vsyncadd [#allocation8], 4294967280 }
   0xb   :  { %12 = sfence }
   0xc   :  { %13 = vsyncpa [#allocation11], 0 }
   0xd   :  { %15 = vsyncpa [#allocation11 + $0x1], 0 }
   0xe   :  { %16 = vsyncpa [#allocation12], 0  ;;  %s935_s25 = smov 0   ;;  %s937_s26 = smov 0  }
   0xf   :  { %s939_s27 = smov 0  }
  0x10 LB: > { %s686_s0 = sadd.s32 4294967295, %s885_s27   ;;  %s34_s28 = sadd.s32 1, %s881_s26  ;;  %s885_s27 = sphi %s939_s27, %s22_s27   ;;  %s881_s26 = sphi %s937_s26, %s1116_s26   ;;  %s877_s25 = sphi %s935_s25, %s1115_s25  }
  0x11   : > { %p36_p3 = scmp.ge.s32.totalorder %s34_s28, 2  ;;  %p740_p4 = scmp.lt.s32.totalorder %s885_s27, 2 }
  0x12   : > { %p741_p5 = scmp.eq.s32.totalorder %s885_s27, 0  ;;  %s888_s29 = smov [#allocation10]  }
  0x13   : > { %s1118_s28 = smov (%p36_p3, %s34_s28), 0  ;;  %s170_s30 = sshll.u32 %s888_s29, 4  ;;  %s171_s30 = int_to_ptr.vmem [resolvable:$true] %s170_s30 }
  0x14   : > { %p956_p6 = pnand %p741_p5, %p740_p4  ;;  %s799_s8 = scalar_lea.hbm %s1107_s1, 1280 }
  0x15   : > { %p800_p9 = scmp.ne.s32.totalorder %s1107_s1, %s799_s8  ;;  %p806_p13 = scmp.lt.u32.totalorder %s799_s8, %s1107_s1 }
  0x16   : > { %p801_p10 = pneg %p956_p6 }
  0x18   : > { %p802_p11 = pnand %p801_p10, %p800_p9 }
  0x1a   : > { %p803_p12 = pneg %p802_p11 }
  0x1c   : > { %p808_p0 = pnand %p806_p13, %p803_p12 }
  0x1e   : > { %811 = shalt.err (!%p808_p0)
}
  0x1f   : > { %s812_s13 = scalar_lea.vmem %s171_s30, 1280  ;;  %s819_s14 = scalar_lea.vmem %s171_s30, 2560 }
  0x20   : > { %p813_p1 = scmp.ne.s32.totalorder %s171_s30, %s812_s13  ;;  %p820_p4 = scmp.lt.s32.totalorder %s171_s30, %s171_s30 }
  0x21   : > { %p821_p5 = scmp.lt.s32.totalorder %s819_s14, %s812_s13 }
  0x22   : > { %p815_p2 = pnand %p813_p1, %p801_p10 }
  0x23   : > { %p822_p7 = por %p821_p5, %p820_p4 }
  0x24   : > { %p816_p3 = pneg %p815_p2 }
  0x26   : > { %p823_p8 = pnand %p822_p7, %p816_p3 }
  0x28   : > { %826 = shalt.err (!%p823_p8)
}
  0x29   : > { %s889_s15 = smov 640   ;;  %s890_s16 = smov 40  }
  0x2a   : > { %739 = dma.hbm_to_vmem [thread:$0]  (!%p956_p6), %s1107_s1, 1280, %s171_s30, [#allocation11], %s889_s15, %s889_s15, %s890_s16  }
  0x2b   : > { %p1112_p9 = scmp.lt.s32.totalorder %s885_s27, 3  ;;  %p1113_p11 = scmp.ge.s32.totalorder %s885_s27, 1 }
  0x2d   : > { %p179_p10 = pnand %p1113_p11, %p1112_p9 }
  0x2e   : > { %p742_p12 = scmp.eq.s32.totalorder (!%p179_p10), %s686_s0, 0 }
  0x2f   : > { %182 = sbr.rel (%p179_p10) target bundleno = 1579 (0x62b), region = 32 }
  0x36   : > { %868 = dma.done.wait (%p742_p12), [#allocation11], 1280  }
  0x37   : > { %870 = vsyncadd (%p742_p12), [#allocation11], 4294966016  ;;  %v984_v0 = vld [vmem:[#allocation10] sm:$0xff]  ;;  %v986_v1 = vld [vmem:[#allocation10 + $0x8] sm:$0xff]  ;;  %p692_p6 = scmp.ne.s32.totalorder %s877_s25, 0 }
  0x38   : > { %v988_v2 = vld [vmem:[#allocation10 + $0x10] sm:$0xff]  ;;  %v990_v3 = vld [vmem:[#allocation10 + $0x18] sm:$0xff]  ;;  %v992_v4 = vld [vmem:[#allocation10 + $0x20] sm:$0xff]  ;;  %v229_v10 = vadd.f32 (!%p692_p6), %v986_v1, %v984_v0  ;;  %vm232_vm0 = vcmask (!%p692_p6), 523264   ;;  %v891_v21 = vmov (!%p692_p6), 0   ;;  %v263_v29 = vlaneseq (!%p692_p6)  ;;  %s373_s22 = sld [smem:[#allocation9]] (!%p692_p6) }
  0x39   : > { %v994_v5 = vld [vmem:[#allocation10 + $0x28] sm:$0xff]  ;;  %v996_v6 = vld [vmem:[#allocation10 + $0x30] sm:$0xff]  ;;  %v998_v7 = vld [vmem:[#allocation10 + $0x38] sm:$0xff]  ;;  %224 = sbr.rel (%p692_p6) target bundleno = 827 (0x33b), region = 40  ;;  %v233_v12 = vsel (!%p692_p6), %vm232_vm0, %v992_v4, 0.0  ;;  %780 = vset.pattern.permute.xlu0 (!%p692_p6), %v891_v21  ;;  %vm252_vm1 = vcmask (!%p692_p6), 0  }
  0x3a   : > { %v1000_v8 = vld [vmem:[#allocation10 + $0x40] sm:$0xff]  ;;  %v1002_v9 = vld [vmem:[#allocation10 + $0x48] sm:$0xff]  ;;  %v230_v11 = vadd.f32 (!%p692_p6), %v229_v10, %v988_v2  ;;  %v264_v32 = vshrl.u32 (!%p692_p6), %v263_v29, 7  ;;  %vm254_vm2 = vcmask (!%p692_p6), 7168   ;;  %v892_v36 = vmov (!%p692_p6), 0.0   ;;  %s693_s23 = sld [smem:[#allocation9 + $0x1]] (!%p692_p6) }
  0x3b   : > { %v239_v18 = vsel (!%p692_p6), %vm232_vm0, %v1002_v9, 0.0  ;;  %255 = vst.msk [vmem:[#allocation2] sm:$0xff] (!%p692_p6), %vm254_vm2, %v892_v36  ;;  %259 = vst.msk [vmem:[#allocation7] sm:$0xff] (!%p692_p6), %vm254_vm2, %v892_v36 }
  0x3c   : > { %v231_v13 = vadd.f32 (!%p692_p6), %v230_v11, %v990_v3  ;;  %v265_v33 = vsub.s32 (!%p692_p6), 0, %v264_v32  ;;  %260 = vst.msk [vmem:[#allocation7 + $0x8] sm:$0xff] (!%p692_p6), %vm254_vm2, %v892_v36  ;;  %256 = vst.msk [vmem:[#allocation2 + $0x8] sm:$0xff] (!%p692_p6), %vm254_vm2, %v892_v36 }
  0x3d   : > { %257 = vst.msk [vmem:[#allocation3] sm:$0xff] (!%p692_p6), %vm254_vm2, %v892_v36  ;;  %258 = vst.msk [vmem:[#allocation3 + $0x8] sm:$0xff] (!%p692_p6), %vm254_vm2, %v892_v36 }
  0x3e   : > { %v234_v14 = vadd.f32 (!%p692_p6), %v233_v12, %v231_v13 }
  0x40   : > { %v235_v15 = vadd.f32 %v234_v14, %v994_v5 }
  0x42   : > { %v236_v16 = vadd.f32 %v235_v15, %v996_v6 }
  0x44   : > { %v237_v17 = vadd.f32 %v236_v16, %v998_v7 }
  0x46   : > { %v238_v19 = vadd.f32 %v237_v17, %v1000_v8 }
  0x48   : > { %v240_v20 = vadd.f32 %v239_v18, %v238_v19 }
  0x4a   : > { %241 = vadd.xlane.f32.xlu0 %v240_v20 }
  0xd7   : > { %v242_v22 = vpop.xlane.xlu0 %241 }
  0xd8   : > { %v243_v23 = vrot.slane %v242_v22, 4 }
  0xda   : > { %v244_v24 = vadd.f32 %v243_v23, %v242_v22 }
  0xdc   : > { %v245_v25 = vrot.slane %v244_v24, 2 }
  0xde   : > { %v246_v26 = vadd.f32 %v245_v25, %v244_v24  ;;  %v281_v24 = vld [vmem:[#allocation2] sm:$0xff] }
  0xe0   : > { %v247_v27 = vrot.slane %v246_v26, 1 }
  0xe2   : > { %v248_v28 = vadd.f32 %v247_v27, %v246_v26  ;;  %v282_v27 = vld [vmem:[#allocation2 + $0x8] sm:$0xff] }
  0xe4   : > { %722 = vpush %v248_v28 }
 0x115   : > { %s723_s19 = spop %722 }
 0x116   : > { %v250_v30 = vstv %s723_s19 }
 0x117   : > { %v251_v31 = vmul.f32 0.000108506945, %v250_v30  ;;  %v303_v30 = vld [vmem:[#allocation3] sm:$0xff] }
 0x119   : > { %253 = vst.msk [vmem:[#allocation4] sm:$0x1] %vm252_vm1, %v251_v31 }
 0x120   : > { %v1018_v34 = vld [vmem:[#allocation4] sm:$0x1] }
 0x121   : > { %v266_v35 = vrot.slane %v1018_v34, %v265_v33  ;;  %v304_v33 = vld [vmem:[#allocation3 + $0x8] sm:$0xff] }
 0x123   : > { %268 = vperm.xlu0 %780, %v266_v35  }
 0x1a2   : > { %v269_v37 = vpop.permute.xlu0 %268 }
 0x1a3   : > { %v271_v38 = vsub.f32 %v984_v0, %v269_v37  ;;  %v272_v39 = vsub.f32 %v986_v1, %v269_v37  ;;  %v276_v40 = vsub.f32 %v994_v5, %v269_v37  ;;  %v277_v41 = vsub.f32 %v996_v6, %v269_v37 }
 0x1a4   : > { %v273_v42 = vsub.f32 %v988_v2, %v269_v37  ;;  %v275_v45 = vsub.f32 %v992_v4, %v269_v37  ;;  %v278_v46 = vsub.f32 %v998_v7, %v269_v37  ;;  %v274_v49 = vsub.f32 %v990_v3, %v269_v37 }
 0x1a5   : > { %v283_v43 = vadd.f32 %v272_v39, %v271_v38  ;;  %v305_v44 = vmul.f32 %v271_v38, %v271_v38  ;;  %v291_v47 = vadd.f32 %v277_v41, %v276_v40  ;;  %v306_v48 = vmul.f32 %v272_v39, %v272_v39 }
 0x1a6   : > { %v310_v53 = vmul.f32 %v276_v40, %v276_v40  ;;  %v311_v54 = vmul.f32 %v277_v41, %v277_v41  ;;  %v279_v56 = vsub.f32 %v1000_v8, %v269_v37  ;;  %v307_v57 = vmul.f32 %v273_v42, %v273_v42 }
 0x1a7   : > { %v284_v50 = vadd.f32 %v283_v43, %v273_v42  ;;  %v292_v51 = vadd.f32 %v291_v47, %v278_v46  ;;  %v315_v52 = vadd.f32 %v306_v48, %v305_v44  ;;  %v287_v58 = vsel %vm232_vm0, %v275_v45, 0.0 }
 0x1a8   : > { %v280_v59 = vsub.f32 %v1002_v9, %v269_v37  ;;  %v322_v63 = vadd.f32 %v311_v54, %v310_v53  ;;  %v308_v10 = vmul.f32 %v274_v49, %v274_v49  ;;  %v312_v11 = vmul.f32 %v278_v46, %v278_v46 }
 0x1a9   : > { %v285_v55 = vadd.f32 %v284_v50, %v274_v49  ;;  %v293_v61 = vadd.f32 %v292_v51, %v279_v56  ;;  %v316_v62 = vadd.f32 %v315_v52, %v307_v57  ;;  %v309_v13 = vmul.f32 %v275_v45, %v275_v45 }
 0x1aa   : > { %v294_v12 = vsel %vm232_vm0, %v280_v59, 0.0  ;;  %v323_v16 = vadd.f32 %v322_v63, %v312_v11  ;;  %v313_v17 = vmul.f32 %v279_v56, %v279_v56  ;;  %v314_v19 = vmul.f32 %v280_v59, %v280_v59 }
 0x1ab   : > { %v288_v60 = vadd.f32 %v287_v58, %v285_v55  ;;  %v295_v14 = vadd.f32 %v294_v12, %v293_v61  ;;  %v317_v15 = vadd.f32 %v316_v62, %v308_v10  ;;  %v318_v18 = vsel %vm232_vm0, %v309_v13, 0.0 }
 0x1ac   : > { %v324_v21 = vadd.f32 %v323_v16, %v313_v17  ;;  %v325_v22 = vsel %vm232_vm0, %v314_v19, 0.0  ;;  %v381_v19 = vstv %s693_s23 }
 0x1ad   : > { %289 = vadd.xlane.f32.xlu1 %v288_v60  ;;  %v319_v20 = vadd.f32 %v318_v18, %v317_v15  ;;  %v374_v15 = vstv %s373_s22 }
 0x1ae   : > { %v326_v23 = vadd.f32 %v325_v22, %v324_v21 }
 0x1b1   : > { %296 = vadd.xlane.f32.xlu1 %v295_v14 }
 0x1b5   : > { %320 = vadd.xlane.f32.xlu1 %v319_v20 }
 0x1b9   : > { %327 = vadd.xlane.f32.xlu1 %v326_v23 }
 0x23a   : > { %v290_v25 = vpop.xlane.xlu1 %289 }
 0x23b   : > { %v298_v26 = vadd.f32 %v290_v25, %v281_v24 }
 0x23d   : > { %301 = vst.msk [vmem:[#allocation2] sm:$0xff] %vm254_vm2, %v298_v26 }
 0x23e   : > { %v297_v28 = vpop.xlane.xlu1 %296 }
 0x23f   : > { %v299_v29 = vadd.f32 %v297_v28, %v282_v27 }
 0x241   : > { %302 = vst.msk [vmem:[#allocation2 + $0x8] sm:$0xff] %vm254_vm2, %v299_v29 }
 0x242   : > { %v321_v31 = vpop.xlane.xlu1 %320 }
 0x243   : > { %v329_v32 = vadd.f32 %v321_v31, %v303_v30 }
 0x244   : > { %v336_v36 = vld [vmem:[#allocation2] sm:$0xff] }
 0x245   : > { %331 = vst.msk [vmem:[#allocation3] sm:$0xff] %vm254_vm2, %v329_v32  ;;  %v338_v39 = vsel %vm254_vm2, %v336_v36, 0.0 }
 0x246   : > { %v328_v35 = vpop.xlane.xlu1 %327 }
 0x247   : > { %v330_v37 = vadd.f32 %v328_v35, %v304_v33 }
 0x248   : > { %v337_v38 = vld [vmem:[#allocation2 + $0x8] sm:$0xff] }
 0x249   : > { %332 = vst.msk [vmem:[#allocation3 + $0x8] sm:$0xff] %vm254_vm2, %v330_v37  ;;  %v339_v40 = vsel %vm254_vm2, %v337_v38, 0.0 }
 0x24a   : > { %v340_v41 = vadd.f32 %v339_v40, %v338_v39 }
 0x24c   : > { %341 = vadd.xlane.f32.xlu1 %v340_v41  ;;  %v352_v42 = vld [vmem:[#allocation3] sm:$0xff] }
 0x24d   : > { %v354_v44 = vsel %vm254_vm2, %v352_v42, 0.0 }
 0x250   : > { %v353_v43 = vld [vmem:[#allocation3 + $0x8] sm:$0xff] }
 0x251   : > { %v355_v45 = vsel %vm254_vm2, %v353_v43, 0.0 }
 0x252   : > { %v356_v46 = vadd.f32 %v355_v45, %v354_v44 }
 0x254   : > { %357 = vadd.xlane.f32.xlu1 %v356_v46 }
 0x2d9   : > { %v342_v47 = vpop.xlane.xlu1 %341 }
 0x2da   : > { %v343_v48 = vrot.slane %v342_v47, 4 }
 0x2dc   : > { %v344_v49 = vadd.f32 %v343_v48, %v342_v47 }
 0x2de   : > { %v345_v50 = vrot.slane %v344_v49, 2 }
 0x2e0   : > { %v346_v51 = vadd.f32 %v345_v50, %v344_v49 }
 0x2e1   : > { %v358_v52 = vpop.xlane.xlu1 %357 }
 0x2e2   : > { %v359_v53 = vrot.slane %v358_v52, 4  ;;  %v347_v54 = vrot.slane %v346_v51, 1 }
 0x2e4   : > { %v360_v55 = vadd.f32 %v359_v53, %v358_v52  ;;  %v348_v56 = vadd.f32 %v347_v54, %v346_v51 }
 0x2e6   : > { %v361_v57 = vrot.slane %v360_v55, 2  ;;  %724 = vpush %v348_v56 }
 0x2e8   : > { %v362_v58 = vadd.f32 %v361_v57, %v360_v55 }
 0x2ea   : > { %v363_v59 = vrot.slane %v362_v58, 1 }
 0x2ec   : > { %v364_v60 = vadd.f32 %v363_v59, %v362_v58 }
 0x2ee   : > { %726 = vpush %v364_v60 }
 0x317   : > { %s725_s20 = spop %724 }
 0x318   : > { %v350_v61 = vstv %s725_s20 }
 0x319   : > { %v351_v62 = vmul.f32 0.000108506945, %v350_v61 }
 0x31b   : > { %v368_v10 = vmul.f32 %v351_v62, %v351_v62  ;;  %v379_v17 = vadd.f32 %v351_v62, %v1018_v34 }
 0x31f   : > { %s727_s21 = spop %726 }
 0x320   : > { %v366_v63 = vstv %s727_s21 }
 0x321   : > { %v367_v11 = vmul.f32 0.000108506945, %v366_v63 }
 0x323   : > { %v369_v12 = vsub.f32 %v367_v11, %v368_v10 }
 0x325   : > { %v370_v13 = vmax.f32 %v369_v12, 0.0 }
 0x327   : > { %v371_v14 = vadd.f32 1e-05, %v370_v13 }
 0x329   : > { %781 = vrsqrt.f32 %v371_v14 }
 0x333   : > { %v782_v16 = vpop.eup %781 }
 0x334   : > { %v375_v18 = vmul.f32 %v782_v16, %v374_v15 }
 0x336   : > { %377 = vst.msk [vmem:[#allocation5] sm:$0x1] %vm252_vm1, %v375_v18  ;;  %v380_v20 = vmul.f32 %v379_v17, %v375_v18 }
 0x338   : > { %v382_v21 = vsub.f32 %v381_v19, %v380_v20 }
 0x33a   : > { %383 = vst.msk [vmem:[#allocation6] sm:$0x1] %vm252_vm1, %v382_v21 }
 0x33b PF: > { %p694_p7 = scmp.ne.s32.totalorder %s877_s25, 1 }
 0x33c   : > { %v893_v23 = vmov (!%p694_p7), 0   ;;  %vm443_vm3 = vcmask (!%p694_p7), 523264   ;;  %v894_v57 = vmov (!%p694_p7), 0.0|0.0   ;;  %vm895_vm4 = vmmov (!%p694_p7), 0   ;;  %s701_s24 = sld [smem:[#allocation9 + $0x2]] (!%p694_p7)  ;;  %s702_s25 = sld [smem:[#allocation9 + $0x3]] (!%p694_p7) }
 0x33d   : > { %387 = sbr.rel (%p694_p7) target bundleno = 1554 (0x612), region = 52  ;;  %v695_v22 = vld [vmem:[#allocation5] ss:$0 sm:$0xff] (!%p694_p7)  ;;  %783 = vset.pattern.permute.xlu0 (!%p694_p7), %v893_v23  ;;  %784 = vset.pattern.permute.xlu1 (!%p694_p7), %v893_v23  ;;  %v896_v58 = vmov (!%p694_p7), 0.0   ;;  %v466_v59 = vlaneseq (!%p694_p7)  ;;  %v438_v60 = vld [vmem:[#allocation7] sm:$0xff] (!%p694_p7)  ;;  %vm457_vm5 = vcmask (!%p694_p7), 7168  }
 0x33e   : > { %395 = vperm.xlu0 (!%p694_p7), %783, %v695_v22   ;;  %719 = vmatprep.subr.bf16.mxu0 (!%p694_p7), %v894_v57  ;;  %v439_v10 = vld [vmem:[#allocation7 + $0x8] sm:$0xff] (!%p694_p7)  ;;  %vm478_vm9 = vcmask (!%p694_p7), 130048   ;;  %vm580_vm10 = vcmask (!%p694_p7), 1024   ;;  %s703_s29 = sld [smem:[#allocation9 + $0x4]] (!%p694_p7)  ;;  %s704_s30 = sld [smem:[#allocation9 + $0x5]] (!%p694_p7) }
 0x33f   : > { %716 = vmatprep.mubr.msk.f32.mxu0 (!%p694_p7), %vm895_vm4, %v896_v58  ;;  %v467_v61 = vshrl.u32 (!%p694_p7), %v466_v59, 7  ;;  %v469_v14 = vand.u32 (!%p694_p7), 127, %v466_v59 }
 0x341   : > { %v696_v24 = vld [vmem:[#allocation6] ss:$0 sm:$0xff] (!%p694_p7)  ;;  %v472_v11 = vadd.s32 (!%p694_p7), 1, %v467_v61  ;;  %v470_v15 = vmul.u32 (!%p694_p7), 8, %v467_v61 }
 0x342   : > { %415 = vperm.xlu0 (!%p694_p7), %783, %v696_v24   ;;  %v575_v22 = vstv (!%p694_p7), %s701_s24 }
 0x343   : > { %v473_v16 = vmul.u32 (!%p694_p7), 8, %v472_v11  ;;  %vm471_vm6 = vcmp.ge.s32.totalorder (!%p694_p7), %v469_v14, %v470_v15 }
 0x345   : > { %vm474_vm7 = vcmp.lt.s32.totalorder %v469_v14, %v473_v16 }
 0x346   : > { %vm475_vm8 = vmand %vm471_vm6, %vm474_vm7 }
 0x347   : > { %v697_v20 = vsel %vm475_vm8, 1.0, %v896_v58 }
 0x3bd   : > { %v396_v34 = vpop.permute.xlu0 %395 }
 0x3be   : > { %v398_v25 = vmul.f32 %v396_v34, %v984_v0  ;;  %v399_v26 = vmul.f32 %v396_v34, %v986_v1  ;;  %v400_v27 = vmul.f32 %v396_v34, %v988_v2  ;;  %v401_v29 = vmul.f32 %v396_v34, %v990_v3 }
 0x3bf   : > { %v402_v30 = vmul.f32 %v396_v34, %v992_v4  ;;  %v403_v31 = vmul.f32 %v396_v34, %v994_v5  ;;  %v404_v32 = vmul.f32 %v396_v34, %v996_v6  ;;  %v405_v37 = vmul.f32 %v396_v34, %v998_v7 }
 0x3c0   : > { %v406_v0 = vmul.f32 %v396_v34, %v1000_v8  ;;  %v407_v4 = vmul.f32 %v396_v34, %v1002_v9  ;;  %v578_v34 = vstv %s702_s25 }
 0x3c1   : > { %v416_v28 = vpop.permute.xlu0 %415 }
 0x3c2   : > { %v418_v33 = vadd.f32 %v416_v28, %v398_v25  ;;  %v419_v35 = vadd.f32 %v416_v28, %v399_v26  ;;  %v420_v36 = vadd.f32 %v416_v28, %v400_v27  ;;  %v422_v38 = vadd.f32 %v416_v28, %v402_v30 }
 0x3c3   : > { %v423_v1 = vadd.f32 %v416_v28, %v403_v31  ;;  %v424_v39 = vadd.f32 %v416_v28, %v404_v32  ;;  %v421_v2 = vadd.f32 %v416_v28, %v401_v29  ;;  %v425_v3 = vadd.f32 %v416_v28, %v405_v37 }
 0x3c4   : > { %v428_v40 = vmax.f32 %v418_v33, 0.0  ;;  %v429_v41 = vmax.f32 %v419_v35, 0.0  ;;  %v430_v5 = vmax.f32 %v420_v36, 0.0  ;;  %v426_v6 = vadd.f32 %v416_v28, %v406_v0 }
 0x3c5   : > { %v433_v42 = vmax.f32 %v423_v1, 0.0  ;;  %v434_v44 = vmax.f32 %v424_v39, 0.0  ;;  %v432_v45 = vmax.f32 %v422_v38, 0.0  ;;  %v427_v46 = vadd.f32 %v416_v28, %v407_v4 }
 0x3c6   : > { %v440_v43 = vadd.f32 %v429_v41, %v428_v40  ;;  %v431_v7 = vmax.f32 %v421_v2, 0.0  ;;  %v435_v48 = vmax.f32 %v425_v3, 0.0  ;;  %v436_v50 = vmax.f32 %v426_v6, 0.0 }
 0x3c7   : > { %v448_v8 = vadd.f32 %v434_v44, %v433_v42  ;;  %v444_v52 = vsel %vm443_vm3, %v432_v45, 0.0  ;;  %v437_v53 = vmax.f32 %v427_v46, 0.0  ;;  %v602_v42 = vstv %s703_s29 }
 0x3c8   : > { %v441_v47 = vadd.f32 %v440_v43, %v430_v5  ;;  %v606_v6 = vstv %s704_s30 }
 0x3c9   : > { %v449_v51 = vadd.f32 %v448_v8, %v435_v48  ;;  %v451_v9 = vsel %vm443_vm3, %v437_v53, 0.0  ;;  %v699_v8 = vld [vmem:[%s1108_s2] ss:$0 sm:$0xff] }
 0x3ca   : > { %v442_v49 = vadd.f32 %v441_v47, %v431_v7 }
 0x3cb   : > { %v450_v55 = vadd.f32 %v449_v51, %v436_v50  ;;  %v700_v51 = vld [vmem:[%s1109_s3] ss:$0 sm:$0xff] }
 0x3cc   : > { %v445_v54 = vadd.f32 %v444_v52, %v442_v49 }
 0x3cd   : > { %v452_v56 = vadd.f32 %v451_v9, %v450_v55 }
 0x3ce   : > { %446 = vadd.xlane.f32.xlu1 %v445_v54 }
 0x3d2   : > { %453 = vadd.xlane.f32.xlu1 %v452_v56 }
 0x45b   : > { %v447_v62 = vpop.xlane.xlu1 %446 }
 0x45c   : > { %v455_v63 = vadd.f32 %v447_v62, %v438_v60 }
 0x45e   : > { %458 = vst.msk [vmem:[#allocation7] sm:$0xff] %vm457_vm5, %v455_v63 }
 0x45f   : > { %v454_v12 = vpop.xlane.xlu1 %453 }
 0x460   : > { %v456_v13 = vadd.f32 %v454_v12, %v439_v10 }
 0x462   : > { %459 = vst.msk [vmem:[#allocation7 + $0x8] sm:$0xff] %vm457_vm5, %v456_v13 }
 0x465   : > { %v464_v17 = vld [vmem:[#allocation7] sm:$0xff] }
 0x469   : > { %v465_v18 = vld [vmem:[#allocation7 + $0x8] sm:$0xff] }
 0x46a   : > { %v720_v19 = vpack.c.bf16 %v465_v18, %v464_v17 }
 0x46c   : > { %721 = vmatpush3.bf16.msra.mxu0 %v720_v19 }
 0x46f   : > { %717 = vmatmul.mubr.msk.f32.vlgmr.msra.gmra.mrb[0].mxu0 %vm478_vm9, %v697_v20 }
 0x542   : > { %v548_v21 = vpop.f32.mrb[0].mxu0 }
 0x543   : > { %v552_v23 = vmul.f32 0.00021701389, %v548_v21  ;;  %v718_v24 = vpop.f32.mrb[1].mxu0 }
 0x545   : > { %v576_v25 = vmul.f32 %v575_v22, %v552_v23  ;;  %556 = vperm.xlu0 %783, %v552_v23  }
 0x547   : > { %v579_v26 = vadd.f32 %v578_v34, %v576_v25 }
 0x549   : > { %v581_v27 = vsel %vm580_vm10, %v579_v26, 0.0 }
 0x54a   : > { %v582_v28 = vrot.slane %v581_v27, 4 }
 0x54c   : > { %v583_v29 = vadd.f32 %v582_v28, %v581_v27 }
 0x54e   : > { %v584_v30 = vrot.slane %v583_v29, 2 }
 0x550   : > { %v585_v31 = vadd.f32 %v584_v30, %v583_v29 }
 0x552   : > { %v586_v32 = vrot.slane %v585_v31, 1 }
 0x554   : > { %v587_v33 = vadd.f32 %v586_v32, %v585_v31 }
 0x556   : > { %v588_v35 = vmul.f32 0.5, %v587_v33 }
 0x558   : > { %v589_v36 = vsub.f32 %v579_v26, %v588_v35 }
 0x55a   : > { %v590_v37 = vmul.f32 %v589_v36, %v589_v36 }
 0x55c   : > { %v591_v38 = vsel %vm580_vm10, %v590_v37, 0.0 }
 0x55d   : > { %v592_v0 = vrot.slane %v591_v38, 4 }
 0x55f   : > { %v593_v1 = vadd.f32 %v592_v0, %v591_v38 }
 0x561   : > { %v594_v39 = vrot.slane %v593_v1, 2 }
 0x563   : > { %v595_v2 = vadd.f32 %v594_v39, %v593_v1 }
 0x565   : > { %v596_v40 = vrot.slane %v595_v2, 1 }
 0x567   : > { %v597_v41 = vadd.f32 %v596_v40, %v595_v2 }
 0x569   : > { %v598_v3 = vmul.f32 0.5, %v597_v41 }
 0x56b   : > { %v599_v4 = vadd.f32 1e-05, %v598_v3 }
 0x56d   : > { %785 = vrsqrt.f32 %v599_v4 }
 0x577   : > { %v786_v5 = vpop.eup %785 }
 0x578   : > { %v603_v43 = vmul.f32 %v786_v5, %v602_v42 }
 0x57a   : > { %v604_v44 = vmul.f32 %v603_v43, %v589_v36 }
 0x57c   : > { %v607_v45 = vadd.f32 %v606_v6, %v604_v44 }
 0x57e   : > { %v608_v46 = vsub.f32 0.0, %v607_v45 }
 0x580   : > { %v609_v7 = vmul.f32 1.442695, %v608_v46 }
 0x582   : > { %787 = vpow2.f32 %v609_v7 }
 0x58c   : > { %v788_v47 = vpop.eup %787 }
 0x58d   : > { %v611_v48 = vadd.f32 1.0, %v788_v47 }
 0x58f   : > { %614 = vperm.xlu1 %784, %v611_v48  }
 0x5c4   : > { %v557_v49 = vpop.permute.xlu0 %556 }
 0x5c5   : > { %v565_v50 = vmul.f32 %v699_v8, %v557_v49 }
 0x5c7   : > { %v573_v52 = vadd.f32 %v700_v51, %v565_v50 }
 0x60e   : > { %v615_v53 = vpop.permute.xlu1 %614 }
 0x60f   : > { %v617_v54 = vmul.f32 %v615_v53, %v573_v52 }
 0x611   : > { %618 = vst [vmem:[#allocation13] sm:$0x3] %v617_v54 }
 0x612 PF: > { %p1071_p8 = scmp.eq.s32.totalorder %s686_s0, 1  ;;  %s897_s10 = smov [#allocation13]  }
 0x613   : > { %s626_s11 = sshll.u32 %s897_s10, 4  ;;  %s627_s11 = int_to_ptr.vmem [resolvable:$true] %s626_s11 }
 0x614   : > { %s827_s12 = scalar_lea.vmem %s627_s11, 32  ;;  %p834_p2 = scmp.lt.s32.totalorder %s627_s11, %s627_s11 }
 0x615   : > { %p828_p13 = scmp.ne.s32.totalorder %s627_s11, %s827_s12  ;;  %p835_p3 = scmp.lt.s32.totalorder %s827_s12, %s827_s12 }
 0x617   : > { %p829_p0 = pnand %p828_p13, %p1071_p8  ;;  %p836_p4 = por %p835_p3, %p834_p2 }
 0x619   : > { %p830_p1 = pneg %p829_p0 }
 0x61b   : > { %p837_p5 = pnand %p836_p4, %p830_p1 }
 0x61d   : > { %840 = shalt.err (!%p837_p5)
}
 0x61e   : > { %s841_s0 = scalar_lea.hbm %s1110_s4, 32 }
 0x61f   : > { %p842_p9 = scmp.ne.s32.totalorder %s1110_s4, %s841_s0  ;;  %p847_p12 = scmp.lt.u32.totalorder %s841_s0, %s1110_s4 }
 0x621   : > { %p843_p11 = pnand %p842_p9, %p1071_p8 }
 0x623   : > { %p844_p10 = pneg %p843_p11 }
 0x625   : > { %p849_p6 = pnand %p847_p12, %p844_p10 }
 0x627   : > { %852 = shalt.err (!%p849_p6)
}
 0x628   : > { %733 = dma.vmem_to_hbm [thread:$0]  (%p1071_p8), %s627_s11, 32, %s1110_s4, [#allocation12]  }
 0x629   : > { %872 = dma.done.wait (%p1071_p8), [#allocation12], 32  }
 0x62a   : > { %874 = vsyncadd (%p1071_p8), [#allocation12], 4294967264 }
 0x62b PF: > { %s22_s27 = sadd.s32 1, %s885_s27   ;;  %s1115_s25 = smov %s881_s26 }
 0x62c   : > { %p19_p7 = scmp.ge.s32.totalorder %s22_s27, 4   ;;  %s1116_s26 = smov %s1118_s28 }
 0x62e   :  { %21 = sbr.rel (!%p19_p7) target bundleno = 16 (0x10), region = 89 }
 0x635   :  { %639 = vsyncpa [#allocation11], 1 }
 0x636   :  { %641 = vsyncpa [#allocation11 + $0x1], 1 }
 0x637   :  { %642 = vsyncpa [#allocation12], 1 }
 0x638   :  { %644 = vsyncpa [#allocation12 + $0x1], 1 }

</bundles_post_ra>
